<compile_context>
chip_gen: v5e
topology: v5e:2x2
jax: 0.10.0
libtpu: 0.0.40
codegen_flags: <defaults>
</compile_context>

<pallas_src>
import functools

import jax
import jax.numpy as jnp
from jax.experimental import pallas as pl
from jax.experimental.pallas import tpu as pltpu


def _round_up(x, m):
    return (x + m - 1) // m * m


def _make_dbn_kernel(n_layers):
    """Build a fused n-layer DBN visible->hidden kernel.

    Ref order: v, (W_0, b_0, u_0), ..., (W_{L-1}, b_{L-1}, u_{L-1}),
               h_prob_out, h_out.
    All refs are VMEM f32 tiles; last dims are padded to 128 lanes.
    """

    def kernel(*refs):
        hprob_ref, h_ref = refs[-2], refs[-1]
        v = refs[0][...]
        p = None
        h = None
        idx = 1
        for _ in range(n_layers):
            w = refs[idx][...]
            b = refs[idx + 1][...]
            u = refs[idx + 2][...]
            idx += 3
            logits = jnp.dot(v, w, preferred_element_type=jnp.float32) + b
            p = jax.nn.sigmoid(logits)
            h = (u < p).astype(jnp.float32)   # Bernoulli sample
            v = h                              # chained DBN forward
        hprob_ref[...] = p
        h_ref[...] = h

    return kernel


@functools.partial(jax.jit, static_argnames=("out_h",))
def _dbn_forward(x, key, weights, biases, *, out_h):
    """Jitted fused forward.  weights/biases are zero-padded f32 params."""
    n_layers = len(weights)
    B = x.shape[0]
    v = jnp.reshape(x, (B, -1)).astype(jnp.float32)
    V = v.shape[1]
    Vp = weights[0].shape[0]
    Hlast_p = weights[-1].shape[1]

    # Batch padding / tiling: pad to 8 sublanes; tile at 128 rows when large.
    if B <= 128:
        B_pad = _round_up(B, 8)
        TB = B_pad
    else:
        B_pad = _round_up(B, 128)
        TB = 128
    grid = (B_pad // TB,)

    v_pad = jnp.zeros((B_pad, Vp), jnp.float32).at[:B, :V].set(v)

    inputs = [v_pad]
    in_specs = [pl.BlockSpec((TB, Vp), lambda i: (i, 0))]
    layer_keys = jax.random.split(key, n_layers)
    for l in range(n_layers):
        Hp = weights[l].shape[1]
        u = jax.random.uniform(layer_keys[l], (B_pad, Hp), dtype=jnp.float32)
        inputs += [weights[l], biases[l], u]
        in_specs += [
            pl.BlockSpec(weights[l].shape, lambda i: (0, 0)),  # weights resident
            pl.BlockSpec((1, Hp), lambda i: (0, 0)),
            pl.BlockSpec((TB, Hp), lambda i: (i, 0)),
        ]

    hprob_pad, h_pad = pl.pallas_call(
        _make_dbn_kernel(n_layers),
        out_shape=(
            jax.ShapeDtypeStruct((B_pad, Hlast_p), jnp.float32),
            jax.ShapeDtypeStruct((B_pad, Hlast_p), jnp.float32),
        ),
        grid=grid,
        in_specs=in_specs,
        out_specs=(
            pl.BlockSpec((TB, Hlast_p), lambda i: (i, 0)),
            pl.BlockSpec((TB, Hlast_p), lambda i: (i, 0)),
        ),
        compiler_params=pltpu.CompilerParams(
            dimension_semantics=("parallel",)),
    )(*inputs)

    return hprob_pad[:B, :out_h], h_pad[:B, :out_h]


class DBNNetPallas:
    """Deterministic JAX/Pallas re-implementation of DBNNet's forward pass."""

    def __init__(self, visible_units=256, hidden_units=(64, 100), seed=0):
        self.n_layers = len(hidden_units)
        self.out_h = hidden_units[-1]
        key = jax.random.PRNGKey(seed)

        weights, biases = [], []
        in_size = visible_units
        in_pad = _round_up(visible_units, 128)
        for h in hidden_units:
            hp = _round_up(h, 128)
            key, wk = jax.random.split(key)
            # RBM default init: small random normal weights, zero hidden bias.
            w = 0.01 * jax.random.normal(wk, (in_size, h), dtype=jnp.float32)
            w_pad = jnp.zeros((in_pad, hp), jnp.float32).at[:in_size, :h].set(w)
            b_pad = jnp.zeros((1, hp), jnp.float32)
            weights.append(w_pad)
            biases.append(b_pad)
            in_size, in_pad = h, hp
        self.weights = tuple(weights)
        self.biases = tuple(biases)

    def forward(self, x, key=None):
        if key is None:
            key = jax.random.PRNGKey(1234)  # deterministic default sampling
        return _dbn_forward(x, key, self.weights, self.biases, out_h=self.out_h)


if __name__ == "__main__":
    key = jax.random.PRNGKey(0)
    # visible_units = 256  ->  batch=2 images of 16x16 flattened to 256
    x = jax.random.uniform(key, (2, 16, 16), dtype=jnp.float32)

    model = DBNNetPallas(visible_units=256, hidden_units=(64, 100), seed=0)
    h_prob, h = model.forward(x, key=jax.random.PRNGKey(42))
    h_prob = jax.block_until_ready(h_prob)
    h = jax.block_until_ready(h)

    assert h_prob.shape == (2, 100) and h.shape == (2, 100)
    assert h_prob.dtype == jnp.float32 and h.dtype == jnp.float32
    # probabilities in (0,1), samples in {0,1}
    assert bool(jnp.all((h_prob > 0.0) & (h_prob < 1.0)))
    assert bool(jnp.all((h == 0.0) | (h == 1.0)))
    print("KERNEL_OK")
</pallas_src>

<mosaic_0001>
module attributes {stable_mosaic.version = 11 : i64} {
  func.func @kernel(%arg0: i32, %arg1: memref<8x256xf32, #tpu.memory_space<vmem>>, %arg2: memref<256x128xf32, #tpu.memory_space<vmem>>, %arg3: memref<1x128xf32, #tpu.memory_space<vmem>>, %arg4: memref<8x128xf32, #tpu.memory_space<vmem>>, %arg5: memref<128x128xf32, #tpu.memory_space<vmem>>, %arg6: memref<1x128xf32, #tpu.memory_space<vmem>>, %arg7: memref<8x128xf32, #tpu.memory_space<vmem>>, %arg8: memref<8x128xf32, #tpu.memory_space<vmem>>, %arg9: memref<8x128xf32, #tpu.memory_space<vmem>>) attributes {dimension_semantics = [#tpu.dimension_semantics<parallel>], iteration_bounds = array<i64: 1>, scalar_prefetch = 0 : i64, scratch_operands = 0 : i64, tpu.core_type = #tpu.core_type<tc>, window_params = [{transform_indices = @transform_0, window_bounds = array<i64: 8, 256>}, {pipeline_mode = #tpu.pipeline_mode<synchronous>, transform_indices = @transform_1, window_bounds = array<i64: 256, 128>}, {pipeline_mode = #tpu.pipeline_mode<synchronous>, transform_indices = @transform_2, window_bounds = array<i64: 1, 128>}, {transform_indices = @transform_3, window_bounds = array<i64: 8, 128>}, {pipeline_mode = #tpu.pipeline_mode<synchronous>, transform_indices = @transform_4, window_bounds = array<i64: 128, 128>}, {pipeline_mode = #tpu.pipeline_mode<synchronous>, transform_indices = @transform_5, window_bounds = array<i64: 1, 128>}, {transform_indices = @transform_6, window_bounds = array<i64: 8, 128>}, {transform_indices = @transform_7, window_bounds = array<i64: 8, 128>}, {transform_indices = @transform_8, window_bounds = array<i64: 8, 128>}]} {
    %c0 = arith.constant 0 : index
    %c0_0 = arith.constant 0 : index
    %0 = vector.load %arg1[%c0, %c0_0] : memref<8x256xf32, #tpu.memory_space<vmem>>, vector<8x256xf32>
    %c0_1 = arith.constant 0 : index
    %c0_2 = arith.constant 0 : index
    %1 = vector.load %arg2[%c0_1, %c0_2] : memref<256x128xf32, #tpu.memory_space<vmem>>, vector<256x128xf32>
    %c0_3 = arith.constant 0 : index
    %c0_4 = arith.constant 0 : index
    %2 = vector.load %arg3[%c0_3, %c0_4] : memref<1x128xf32, #tpu.memory_space<vmem>>, vector<1x128xf32>
    %c0_5 = arith.constant 0 : index
    %c0_6 = arith.constant 0 : index
    %3 = vector.load %arg4[%c0_5, %c0_6] : memref<8x128xf32, #tpu.memory_space<vmem>>, vector<8x128xf32>
    %cst = arith.constant dense<0.000000e+00> : vector<8x128xf32>
    %4 = tpu.matmul %0, %1, %cst {dimension_numbers = #tpu.dot_dimension_numbers<[1], [0], [0], [1], [0, 0, 1, 1], [], []>} : vector<8x256xf32>, vector<256x128xf32>, vector<8x128xf32> -> vector<8x128xf32>
    %5 = vector.broadcast %2 : vector<1x128xf32> to vector<8x128xf32>
    %6 = arith.addf %4, %5 : vector<8x128xf32>
    %7 = arith.negf %6 : vector<8x128xf32>
    %8 = math.exp %7 : vector<8x128xf32>
    %cst_7 = arith.constant 1.000000e+00 : f32
    %9 = vector.broadcast %cst_7 : f32 to vector<8x128xf32>
    %10 = arith.addf %9, %8 : vector<8x128xf32>
    %11 = arith.divf %9, %10 : vector<8x128xf32>
    %12 = arith.cmpf olt, %3, %11 : vector<8x128xf32>
    %13 = arith.extui %12 : vector<8x128xi1> to vector<8x128xi32>
    %14 = arith.sitofp %13 : vector<8x128xi32> to vector<8x128xf32>
    %c0_8 = arith.constant 0 : index
    %c0_9 = arith.constant 0 : index
    %15 = vector.load %arg5[%c0_8, %c0_9] : memref<128x128xf32, #tpu.memory_space<vmem>>, vector<128x128xf32>
    %c0_10 = arith.constant 0 : index
    %c0_11 = arith.constant 0 : index
    %16 = vector.load %arg6[%c0_10, %c0_11] : memref<1x128xf32, #tpu.memory_space<vmem>>, vector<1x128xf32>
    %c0_12 = arith.constant 0 : index
    %c0_13 = arith.constant 0 : index
    %17 = vector.load %arg7[%c0_12, %c0_13] : memref<8x128xf32, #tpu.memory_space<vmem>>, vector<8x128xf32>
    %cst_14 = arith.constant dense<0.000000e+00> : vector<8x128xf32>
    %18 = tpu.matmul %14, %15, %cst_14 {dimension_numbers = #tpu.dot_dimension_numbers<[1], [0], [0], [1], [0, 0, 1, 1], [], []>} : vector<8x128xf32>, vector<128x128xf32>, vector<8x128xf32> -> vector<8x128xf32>
    %19 = vector.broadcast %16 : vector<1x128xf32> to vector<8x128xf32>
    %20 = arith.addf %18, %19 : vector<8x128xf32>
    %21 = arith.negf %20 : vector<8x128xf32>
    %22 = math.exp %21 : vector<8x128xf32>
    %cst_15 = arith.constant 1.000000e+00 : f32
    %23 = vector.broadcast %cst_15 : f32 to vector<8x128xf32>
    %24 = arith.addf %23, %22 : vector<8x128xf32>
    %25 = arith.divf %23, %24 : vector<8x128xf32>
    %26 = arith.cmpf olt, %17, %25 : vector<8x128xf32>
    %27 = arith.extui %26 : vector<8x128xi1> to vector<8x128xi32>
    %28 = arith.sitofp %27 : vector<8x128xi32> to vector<8x128xf32>
    %c0_16 = arith.constant 0 : index
    %c0_17 = arith.constant 0 : index
    %29 = vector.load %arg8[%c0_16, %c0_17] : memref<8x128xf32, #tpu.memory_space<vmem>>, vector<8x128xf32>
    tpu.vector_store %arg8[%c0_16, %c0_17], %25 {strides = array<i32>} : memref<8x128xf32, #tpu.memory_space<vmem>>, vector<8x128xf32>,
    %c0_18 = arith.constant 0 : index
    %c0_19 = arith.constant 0 : index
    %30 = vector.load %arg9[%c0_18, %c0_19] : memref<8x128xf32, #tpu.memory_space<vmem>>, vector<8x128xf32>
    tpu.vector_store %arg9[%c0_18, %c0_19], %28 {strides = array<i32>} : memref<8x128xf32, #tpu.memory_space<vmem>>, vector<8x128xf32>,
    return
  }
  func.func @transform_0(%arg0: i32) -> (i32, i32) {
    %c0_i32 = arith.constant 0 : i32
    %c0_i32_0 = arith.constant 0 : i32
    return %arg0, %c0_i32 : i32, i32
  }
  func.func @transform_1(%arg0: i32) -> (i32, i32) {
    %c0_i32 = arith.constant 0 : i32
    %c0_i32_0 = arith.constant 0 : i32
    %c0_i32_1 = arith.constant 0 : i32
    return %c0_i32, %c0_i32_0 : i32, i32
  }
  func.func @transform_2(%arg0: i32) -> (i32, i32) {
    %c0_i32 = arith.constant 0 : i32
    %c0_i32_0 = arith.constant 0 : i32
    %c0_i32_1 = arith.constant 0 : i32
    return %c0_i32, %c0_i32_0 : i32, i32
  }
  func.func @transform_3(%arg0: i32) -> (i32, i32) {
    %c0_i32 = arith.constant 0 : i32
    %c0_i32_0 = arith.constant 0 : i32
    return %arg0, %c0_i32 : i32, i32
  }
  func.func @transform_4(%arg0: i32) -> (i32, i32) {
    %c0_i32 = arith.constant 0 : i32
    %c0_i32_0 = arith.constant 0 : i32
    %c0_i32_1 = arith.constant 0 : i32
    return %c0_i32, %c0_i32_0 : i32, i32
  }
  func.func @transform_5(%arg0: i32) -> (i32, i32) {
    %c0_i32 = arith.constant 0 : i32
    %c0_i32_0 = arith.constant 0 : i32
    %c0_i32_1 = arith.constant 0 : i32
    return %c0_i32, %c0_i32_0 : i32, i32
  }
  func.func @transform_6(%arg0: i32) -> (i32, i32) {
    %c0_i32 = arith.constant 0 : i32
    %c0_i32_0 = arith.constant 0 : i32
    return %arg0, %c0_i32 : i32, i32
  }
  func.func @transform_7(%arg0: i32) -> (i32, i32) {
    %c0_i32 = arith.constant 0 : i32
    %c0_i32_0 = arith.constant 0 : i32
    return %arg0, %c0_i32 : i32, i32
  }
  func.func @transform_8(%arg0: i32) -> (i32, i32) {
    %c0_i32 = arith.constant 0 : i32
    %c0_i32_0 = arith.constant 0 : i32
    return %arg0, %c0_i32 : i32, i32
  }
}

</mosaic_0001>

<bundles_post_ra>
// kernel: _dbn_forward.3
= control target key start
LH: loop header
LB: loop body
LE: loop exit
PB: predicated region body
PF: predicated region fallthrough
CT: control target
= control target key end

     0   :  { %14 = vsyncpa [#allocation3], 0  ;;  %s390_s0 = inlined_call_operand.vmem [shape: f32[8,256], index: 0, kind: input, shape index: {}]   ;;  %s391_s1 = inlined_call_operand.hbm [shape: f32[256,128], index: 1, kind: input, shape index: {}]   ;;  %s392_s2 = inlined_call_operand.vmem [shape: f32[1,128], index: 2, kind: input, shape index: {}]   ;;  %s393_s3 = inlined_call_operand.vmem [shape: f32[8,128], index: 3, kind: input, shape index: {}]   ;;  %s394_s4 = inlined_call_operand.hbm [shape: f32[128,128], index: 4, kind: input, shape index: {}]   ;;  %s395_s5 = inlined_call_operand.vmem [shape: f32[1,128], index: 5, kind: input, shape index: {}]   ;;  %s396_s6 = inlined_call_operand.vmem [shape: f32[8,128], index: 6, kind: input, shape index: {}]   ;;  %s397_s7 = inlined_call_operand.vmem [shape: f32[8,128], index: 7, kind: output, shape index: {0}]   ;;  %s398_s8 = inlined_call_operand.vmem [shape: f32[8,128], index: 8, kind: output, shape index: {1}]  }
   0x1   :  { %s22_s29 = sshll.u32 %s391_s1, 4  ;;  %s23_s29 = int_to_ptr.hbm [resolvable:$true] %s22_s29 }
   0x2   :  { %15 = vsyncpa [#allocation5], 0  ;;  %s309_s30 = smov [#allocation2]   ;;  %s39_s12 = sshll.u32 %s394_s4, 4  ;;  %s40_s12 = int_to_ptr.hbm [resolvable:$true] %s39_s12 }
   0x3   :  { %s24_s9 = sshll.u32 %s309_s30, 4  ;;  %s310_s13 = smov 128   ;;  %s25_s9 = int_to_ptr.vmem [resolvable:$true] %s24_s9 }
   0x4   :  { %s311_s14 = smov 8   ;;  %s312_s15 = smov [#allocation4]  }
   0x5   :  { %30 = dma.hbm_to_vmem [thread:$0]  %s23_s29, 4096, %s25_s9, [#allocation3], %s310_s13, %s310_s13, %s311_s14  }
   0x6   :  { %s41_s16 = sshll.u32 %s312_s15, 4  ;;  %s42_s16 = int_to_ptr.vmem [resolvable:$true] %s41_s16 }
   0x7   :  { %47 = dma.hbm_to_vmem [thread:$0]  %s40_s12, 2048, %s42_s16, [#allocation5], %s310_s13, %s310_s13, %s311_s14  }
   0x8   :  { %305 = dma.done.wait [#allocation3], 4096  }
   0x9   :  { %306 = vsyncadd [#allocation3], 4294963200 }
   0xa   :  { %307 = dma.done.wait [#allocation5], 2048  }
   0xb   :  { %308 = vsyncadd [#allocation5], 4294965248  ;;  %v77_v0 = vld [vmem:[#allocation2 + $0x78] sm:$0xff]  ;;  %v76_v1 = vld [vmem:[#allocation2 + $0x70] sm:$0xff] }
   0xc   :  { %v93_v2 = vld [vmem:[#allocation2 + $0xf8] sm:$0xff]  ;;  %99 = vmatpush.msra.mxu0 %v77_v0  ;;  %v92_v3 = vld [vmem:[#allocation2 + $0xf0] sm:$0xff]  ;;  %v75_v4 = vld [vmem:[#allocation2 + $0x68] sm:$0xff] }
   0xd   :  { %119 = vmatpush.msra.mxu1 %v93_v2  ;;  %v91_v5 = vld [vmem:[#allocation2 + $0xe8] sm:$0xff]  ;;  %v74_v6 = vld [vmem:[#allocation2 + $0x60] sm:$0xff]  ;;  %v73_v8 = vld [vmem:[#allocation2 + $0x58] sm:$0xff] }
   0xe   :  { %100 = vmatpush.msra.mxu0 %v76_v1  ;;  %v90_v7 = vld [vmem:[#allocation2 + $0xe0] sm:$0xff]  ;;  %v89_v9 = vld [vmem:[#allocation2 + $0xd8] sm:$0xff]  ;;  %v72_v10 = vld [vmem:[#allocation2 + $0x50] sm:$0xff] }
   0xf   :  { %120 = vmatpush.msra.mxu1 %v92_v3  ;;  %v88_v11 = vld [vmem:[#allocation2 + $0xd0] sm:$0xff]  ;;  %v71_v12 = vld [vmem:[#allocation2 + $0x48] sm:$0xff]  ;;  %v70_v14 = vld [vmem:[#allocation2 + $0x40] sm:$0xff] }
  0x10   :  { %101 = vmatpush.msra.mxu0 %v75_v4  ;;  %v87_v13 = vld [vmem:[#allocation2 + $0xc8] sm:$0xff]  ;;  %v86_v15 = vld [vmem:[#allocation2 + $0xc0] sm:$0xff]  ;;  %v69_v16 = vld [vmem:[#allocation2 + $0x38] sm:$0xff] }
  0x11   :  { %121 = vmatpush.msra.mxu1 %v91_v5  ;;  %v85_v17 = vld [vmem:[#allocation2 + $0xb8] sm:$0xff]  ;;  %v68_v18 = vld [vmem:[#allocation2 + $0x30] sm:$0xff]  ;;  %v67_v20 = vld [vmem:[#allocation2 + $0x28] sm:$0xff]  ;;  %v313_v5 = vmov 1.0  }
  0x12   :  { %102 = vmatpush.msra.mxu0 %v74_v6  ;;  %v84_v19 = vld [vmem:[#allocation2 + $0xb0] sm:$0xff]  ;;  %v83_v21 = vld [vmem:[#allocation2 + $0xa8] sm:$0xff]  ;;  %v66_v22 = vld [vmem:[#allocation2 + $0x20] sm:$0xff] }
  0x13   :  { %122 = vmatpush.msra.mxu1 %v90_v7  ;;  %v82_v23 = vld [vmem:[#allocation2 + $0xa0] sm:$0xff]  ;;  %v65_v24 = vld [vmem:[#allocation2 + $0x18] sm:$0xff]  ;;  %v64_v26 = vld [vmem:[#allocation2 + $0x10] sm:$0xff] }
  0x14   :  { %103 = vmatpush.msra.mxu0 %v73_v8  ;;  %v81_v25 = vld [vmem:[#allocation2 + $0x98] sm:$0xff]  ;;  %v80_v27 = vld [vmem:[#allocation2 + $0x90] sm:$0xff]  ;;  %v63_v28 = vld [vmem:[#allocation2 + $0x8] sm:$0xff] }
  0x15   :  { %123 = vmatpush.msra.mxu1 %v89_v9  ;;  %v79_v29 = vld [vmem:[#allocation2 + $0x88] sm:$0xff]  ;;  %v62_v30 = vld [vmem:[#allocation2] sm:$0xff]  ;;  %v176_v34 = vld [vmem:[#allocation4 + $0x78] sm:$0xff] }
  0x16   :  { %104 = vmatpush.msra.mxu0 %v72_v10  ;;  %v78_v31 = vld [vmem:[#allocation2 + $0x80] sm:$0xff]  ;;  %v61_v33 = vld [vmem:[%s390_s0 + $0x8] sm:$0xff]  ;;  %182 = vmatpush.msra.mxu2 %v176_v34  ;;  %v175_v35 = vld [vmem:[#allocation4 + $0x70] sm:$0xff] }
  0x17   :  { %124 = vmatpush.msra.mxu1 %v88_v11  ;;  %v60_v32 = vld [vmem:[%s390_s0] sm:$0xff]  ;;  %v174_v36 = vld [vmem:[#allocation4 + $0x68] sm:$0xff]  ;;  %v172_v38 = vld [vmem:[#allocation4 + $0x58] sm:$0xff] }
  0x18   :  { %105 = vmatpush.msra.mxu0 %v71_v12  ;;  %183 = vmatpush.msra.mxu2 %v175_v35  ;;  %v173_v37 = vld [vmem:[#allocation4 + $0x60] sm:$0xff]  ;;  %v171_v39 = vld [vmem:[#allocation4 + $0x50] sm:$0xff]  ;;  %v170_v40 = vld [vmem:[#allocation4 + $0x48] sm:$0xff] }
  0x19   :  { %125 = vmatpush.msra.mxu1 %v87_v13  ;;  %v169_v41 = vld [vmem:[#allocation4 + $0x40] sm:$0xff]  ;;  %v168_v42 = vld [vmem:[#allocation4 + $0x38] sm:$0xff]  ;;  %v167_v43 = vld [vmem:[#allocation4 + $0x30] sm:$0xff] }
  0x1a   :  { %106 = vmatpush.msra.mxu0 %v70_v14  ;;  %184 = vmatpush.msra.mxu2 %v174_v36  ;;  %v166_v44 = vld [vmem:[#allocation4 + $0x28] sm:$0xff]  ;;  %v165_v45 = vld [vmem:[#allocation4 + $0x20] sm:$0xff]  ;;  %v164_v46 = vld [vmem:[#allocation4 + $0x18] sm:$0xff] }
  0x1b   :  { %126 = vmatpush.msra.mxu1 %v86_v15  ;;  %v163_v47 = vld [vmem:[#allocation4 + $0x10] sm:$0xff]  ;;  %v162_v48 = vld [vmem:[#allocation4 + $0x8] sm:$0xff]  ;;  %v247_v49 = vld [vmem:[%s392_s2] ss:$0 sm:$0xff] }
  0x1c   :  { %107 = vmatpush.msra.mxu0 %v69_v16  ;;  %185 = vmatpush.msra.mxu2 %v173_v37  ;;  %v161_v50 = vld [vmem:[#allocation4] sm:$0xff] }
  0x1d   :  { %127 = vmatpush.msra.mxu1 %v85_v17  ;;  %v95_v1 = vld [vmem:[%s393_s3] sm:$0xff] }
  0x1e   :  { %108 = vmatpush.msra.mxu0 %v68_v18  ;;  %186 = vmatpush.msra.mxu2 %v172_v38  ;;  %v248_v6 = vld [vmem:[%s395_s5] ss:$0 sm:$0xff] }
  0x1f   :  { %128 = vmatpush.msra.mxu1 %v84_v19  ;;  %v178_v19 = vld [vmem:[%s396_s6] sm:$0xff] }
  0x20   :  { %109 = vmatpush.msra.mxu0 %v67_v20  ;;  %187 = vmatpush.msra.mxu2 %v171_v39 }
  0x21   :  { %129 = vmatpush.msra.mxu1 %v83_v21 }
  0x22   :  { %110 = vmatpush.msra.mxu0 %v66_v22  ;;  %188 = vmatpush.msra.mxu2 %v170_v40 }
  0x23   :  { %130 = vmatpush.msra.mxu1 %v82_v23  ;;  %v314_v23 = vmov 0.0  }
  0x24   :  { %111 = vmatpush.msra.mxu0 %v65_v24  ;;  %189 = vmatpush.msra.mxu2 %v169_v41 }
  0x25   :  { %131 = vmatpush.msra.mxu1 %v81_v25 }
  0x26   :  { %112 = vmatpush.msra.mxu0 %v64_v26  ;;  %190 = vmatpush.msra.mxu2 %v168_v42 }
  0x27   :  { %132 = vmatpush.msra.mxu1 %v80_v27 }
  0x28   :  { %113 = vmatpush.msra.mxu0 %v63_v28  ;;  %191 = vmatpush.msra.mxu2 %v167_v43 }
  0x29   :  { %133 = vmatpush.msra.mxu1 %v79_v29 }
  0x2a   :  { %114 = vmatpush.msra.mxu0 %v62_v30  ;;  %192 = vmatpush.msra.mxu2 %v166_v44 }
  0x2b   :  { %134 = vmatpush.msra.mxu1 %v78_v31  ;;  %115 = vmatmul.f32.vlgmr.msra.gmra.mxu0 %v60_v32 }
  0x2c   :  { %135 = vmatmul.f32.vlgmr.msra.gmra.mxu1 %v61_v33  ;;  %193 = vmatpush.msra.mxu2 %v165_v45 }
  0x2e   :  { %194 = vmatpush.msra.mxu2 %v164_v46 }
  0x30   :  { %195 = vmatpush.msra.mxu2 %v163_v47 }
  0x32   :  { %196 = vmatpush.msra.mxu2 %v162_v48 }
  0x34   :  { %197 = vmatpush.msra.mxu2 %v161_v50 }
  0xa8   :  { %v116_v51 = vpop.f32.mrf.mxu0 }
  0xa9   :  { %v136_v52 = vpop.f32.mrf.mxu1  ;;  %v117_v53 = vadd.f32 %v247_v49, %v116_v51 }
  0xab   :  { %v137_v54 = vadd.f32 %v136_v52, %v117_v53 }
  0xad   :  { %v236_v55 = vmul.f32 -1.442695, %v137_v54 }
  0xaf   :  { %249 = vpow2.f32 %v236_v55 }
  0xb5   :  { %v250_v56 = vpop.eup %249 }
  0xb6   :  { %v142_v57 = vadd.f32 1.0, %v250_v56 }
  0xb8   :  { %251 = vrcp.f32 %v142_v57  ;;  %v154_v61 = vand.u32 2147483648, %v142_v57  ;;  %v152_v63 = vand.u32 2147483647, %v142_v57  ;;  %vm148_vm1 = vweird.f32 %v142_v57 }
  0xba   :  { %v155_v2 = vor.u32 1.1754944e-38, %v154_v61  ;;  %vm153_vm3 = vcmp.eq.f32.partialorder %v152_v63, 8.507059e+37 }
  0xbe   :  { %v252_v58 = vpop.eup %251 }
  0xbf   :  { %v144_v59 = vmul.f32 %v252_v58, %v142_v57  ;;  %vm149_vm0 = vweird.f32 %v252_v58 }
  0xc0   :  { %vm150_vm2 = vmor %vm148_vm1, %vm149_vm0 }
  0xc1   :  { %v145_v60 = vsub.f32 1.0, %v144_v59 }
  0xc3   :  { %v146_v62 = vmul.f32 %v252_v58, %v145_v60 }
  0xc5   :  { %v147_v0 = vadd.f32 %v252_v58, %v146_v62 }
  0xc7   :  { %v151_v3 = vsel %vm150_vm2, %v252_v58, %v147_v0 }
  0xc8   :  { %v156_v4 = vsel %vm153_vm3, %v155_v2, %v151_v3 }
  0xc9   :  { %vm158_vm4 = vcmp.lt.f32.partialorder %v95_v1, %v156_v4 }
  0xca   :  { %238 = vmatmul.msk.f32.vlgmr.msra.gmra.mxu2 %vm158_vm4, %v313_v5 }
 0x14d   :  { %v199_v7 = vpop.f32.mrf.mxu2 }
 0x14e   :  { %v200_v8 = vadd.f32 %v248_v6, %v199_v7 }
 0x150   :  { %v239_v9 = vmul.f32 -1.442695, %v200_v8 }
 0x152   :  { %253 = vpow2.f32 %v239_v9 }
 0x158   :  { %v254_v10 = vpop.eup %253 }
 0x159   :  { %v205_v11 = vadd.f32 1.0, %v254_v10 }
 0x15b   :  { %255 = vrcp.f32 %v205_v11  ;;  %v217_v15 = vand.u32 2147483648, %v205_v11  ;;  %v215_v17 = vand.u32 2147483647, %v205_v11  ;;  %vm211_vm6 = vweird.f32 %v205_v11 }
 0x15d   :  { %v218_v20 = vor.u32 1.1754944e-38, %v217_v15  ;;  %vm216_vm8 = vcmp.eq.f32.partialorder %v215_v17, 8.507059e+37 }
 0x161   :  { %v256_v12 = vpop.eup %255 }
 0x162   :  { %v207_v13 = vmul.f32 %v256_v12, %v205_v11  ;;  %vm212_vm5 = vweird.f32 %v256_v12 }
 0x163   :  { %vm213_vm7 = vmor %vm211_vm6, %vm212_vm5 }
 0x164   :  { %v208_v14 = vsub.f32 1.0, %v207_v13 }
 0x166   :  { %v209_v16 = vmul.f32 %v256_v12, %v208_v14 }
 0x168   :  { %v210_v18 = vadd.f32 %v256_v12, %v209_v16 }
 0x16a   :  { %v214_v21 = vsel %vm213_vm7, %v256_v12, %v210_v18 }
 0x16b   :  { %v219_v22 = vsel %vm216_vm8, %v218_v20, %v214_v21 }
 0x16c   :  { %vm221_vm9 = vcmp.lt.f32.partialorder %v178_v19, %v219_v22  ;;  %224 = vst [vmem:[%s397_s7] sm:$0xff] %v219_v22 }
 0x16d   :  { %v240_v24 = vsel %vm221_vm9, 1.0, %v314_v23 }
 0x16e   :  { %225 = vst [vmem:[%s398_s8] sm:$0xff] %v240_v24 }
 0x16f   :  { %234 = vsyncpa [#allocation3], 1 }
 0x170   :  { %235 = vsyncpa [#allocation5], 1 }

</bundles_post_ra>
